<compile_context>
chip_gen: v6e
topology: v6e:2x2x1
jax: 0.10.0
libtpu: 0.0.40
codegen_flags: <defaults>
</compile_context>

<pallas_src>
import jax
import jax.numpy as jnp
from jax.experimental import pallas as pl
from jax.experimental.pallas import tpu as pltpu


def _round_up(a: int, b: int) -> int:
    return (a + b - 1) // b * b


def _pick_nk_tile(d: int, cap: int) -> int:
    # 128-aligned for tiny dims; 256-aligned (MXU-friendly on v6e/v7x) above.
    if d <= 128:
        return 128
    return min(cap, _round_up(d, 256))


# --------------------------------------------------------------------------
# Small-shape fast path: one full-array block, no grid, no scratch.
# --------------------------------------------------------------------------
def _addmm_single_block_kernel(b_ref, x_ref, w_ref, o_ref):
    o_ref[...] = (
        jnp.dot(x_ref[...], w_ref[...], preferred_element_type=jnp.float32)
        + b_ref[...]
    ).astype(o_ref.dtype)


def _addmm_single_block(bias_scaled, x, weight):
    M, K = x.shape
    _, N = weight.shape
    return pl.pallas_call(
        _addmm_single_block_kernel,
        out_shape=jax.ShapeDtypeStruct((M, N), jnp.float32),
        cost_estimate=pl.CostEstimate(
            flops=2 * M * N * K,
            transcendentals=0,
            bytes_accessed=4 * (M * K + K * N + M * N + N),
        ),
    )(bias_scaled, x, weight)


# --------------------------------------------------------------------------
# General tiled path: accumulate directly in the f32 output tile.
# --------------------------------------------------------------------------
def _addmm_tiled_kernel(b_ref, x_ref, w_ref, o_ref):
    @pl.when(pl.program_id(2) == 0)
    def _():
        # bias is already beta-scaled; init the resident output tile with it.
        o_ref[...] = jnp.broadcast_to(b_ref[...], o_ref.shape)

    o_ref[...] += jnp.dot(
        x_ref[...], w_ref[...], preferred_element_type=jnp.float32
    )


def _addmm_tiled(bias_p, x_p, weight_p, *, tm, tn, tk):
    Mp, Kp = x_p.shape
    _, Np = weight_p.shape
    grid = (Mp // tm, Np // tn, Kp // tk)

    # Double-buffered x & w blocks + resident output tile + bias, with headroom.
    working_set = 4 * (2 * tm * tk + 2 * tk * tn + tm * tn + 2 * tn)
    vmem_limit = min(100 * 1024 * 1024, max(32 * 1024 * 1024, 2 * working_set))

    return pl.pallas_call(
        _addmm_tiled_kernel,
        out_shape=jax.ShapeDtypeStruct((Mp, Np), jnp.float32),
        grid_spec=pltpu.PrefetchScalarGridSpec(
            num_scalar_prefetch=0,
            grid=grid,
            in_specs=[
                pl.BlockSpec((1, tn), lambda i, j, k: (0, j)),   # bias (beta-folded)
                pl.BlockSpec((tm, tk), lambda i, j, k: (i, k)),  # x
                pl.BlockSpec((tk, tn), lambda i, j, k: (k, j)),  # weight (alpha-folded)
            ],
            out_specs=pl.BlockSpec((tm, tn), lambda i, j, k: (i, j)),
        ),
        compiler_params=pltpu.CompilerParams(
            dimension_semantics=("parallel", "parallel", "arbitrary"),
            vmem_limit_bytes=vmem_limit,
        ),
        cost_estimate=pl.CostEstimate(
            flops=2 * Mp * Np * Kp,
            transcendentals=0,
            bytes_accessed=4 * (Mp * Kp + Kp * Np + Mp * Np + Np),
        ),
    )(bias_p, x_p, weight_p)


# --------------------------------------------------------------------------
# Module builder: forward(x) = beta*bias + alpha*(x @ weight)
# --------------------------------------------------------------------------
_SINGLE_BLOCK_BYTES = 8 * 1024 * 1024  # operands this small => single-block kernel


def make_addmm_forward(weight, bias, *, alpha=1.0, beta=0.1):
    K, N = weight.shape
    assert bias.shape == (1, N)

    # Fold alpha/beta into the static parameters once (not per call).
    weight_scaled = (alpha * weight).astype(jnp.float32)
    bias_scaled = (beta * bias).astype(jnp.float32)

    # Static tile choices along N and K; pad static params once, here.
    tn = _pick_nk_tile(N, 512)
    tk = _pick_nk_tile(K, 1024)
    Np = _round_up(N, tn)
    Kp = _round_up(K, tk)
    weight_padded = (
        weight_scaled
        if (Kp, Np) == (K, N)
        else jnp.pad(weight_scaled, ((0, Kp - K), (0, Np - N)))
    )
    bias_padded = (
        bias_scaled if Np == N else jnp.pad(bias_scaled, ((0, 0), (0, Np - N)))
    )

    @jax.jit
    def forward(x):
        M, Kx = x.shape
        assert Kx == K
        xf = x.astype(jnp.float32)

        operand_bytes = 4 * (M * K + K * N + M * N + N)
        if operand_bytes <= _SINGLE_BLOCK_BYTES:
            # Fast path: whole problem as one VMEM block. No grid, no scratch,
            # no wrapper padding/slicing (block_shape == full array dims).
            return _addmm_single_block(bias_scaled, xf, weight_scaled)

        # General tiled path (large shapes).
        tm = min(512, _round_up(M, 8))
        Mp = _round_up(M, tm)
        xp = xf if (Mp, Kp) == (M, K) else jnp.pad(xf, ((0, Mp - M), (0, Kp - K)))
        out = _addmm_tiled(bias_padded, xp, weight_padded, tm=tm, tn=tn, tk=tk)
        if (Mp, Np) != (M, N):
            out = out[:M, :N]
        return out

    return forward


if __name__ == "__main__":
    # Shapes from the module spec: x = torch.randn(1, 64); weight (64, 64) and
    # bias (1, 64) as deterministic synthetic parameters.
    M, K, N = 1, 64, 64

    key = jax.random.PRNGKey(0)
    kx, kw, kb = jax.random.split(key, 3)

    x = jax.random.normal(kx, (M, K), dtype=jnp.float32)
    weight = jax.random.normal(kw, (K, N), dtype=jnp.float32)
    bias = jax.random.normal(kb, (1, N), dtype=jnp.float32)

    forward = make_addmm_forward(weight, bias, alpha=1.0, beta=0.1)
    out = jax.block_until_ready(forward(x))

    # Reference: beta * bias + alpha * (x @ weight)
    ref = 0.1 * bias + jnp.dot(x, weight, precision=jax.lax.Precision.HIGHEST)
    assert out.shape == (M, N)
    assert jnp.allclose(out, ref, atol=1e-5, rtol=1e-5)

    # Also exercise the general tiled path once (larger, misaligned shapes).
    M2, K2, N2 = 2000, 1000, 520
    k2x, k2w, k2b = jax.random.split(jax.random.PRNGKey(1), 3)
    x2 = jax.random.normal(k2x, (M2, K2), dtype=jnp.float32)
    w2 = jax.random.normal(k2w, (K2, N2), dtype=jnp.float32)
    b2 = jax.random.normal(k2b, (1, N2), dtype=jnp.float32)
    fwd2 = make_addmm_forward(w2, b2, alpha=1.0, beta=0.1)
    out2 = jax.block_until_ready(fwd2(x2))
    ref2 = 0.1 * b2 + jnp.dot(x2, w2, precision=jax.lax.Precision.HIGHEST)
    assert out2.shape == (M2, N2)
    assert jnp.allclose(out2, ref2, atol=1e-2, rtol=1e-3)

    print("KERNEL_OK")
</pallas_src>

<mosaic_0001>
module attributes {stable_mosaic.version = 11 : i64} {
  func.func @_addmm_single_block_kernel(%arg0: memref<1x64xf32, #tpu.memory_space<vmem>>, %arg1: memref<1x64xf32, #tpu.memory_space<vmem>>, %arg2: memref<64x64xf32, #tpu.memory_space<vmem>>, %arg3: memref<1x64xf32, #tpu.memory_space<vmem>>) attributes {dimension_semantics = [], scalar_prefetch = 0 : i64, scratch_operands = 0 : i64, tpu.core_type = #tpu.core_type<tc>} {
    %c0 = arith.constant 0 : index
    %c0_0 = arith.constant 0 : index
    %0 = vector.load %arg1[%c0, %c0_0] : memref<1x64xf32, #tpu.memory_space<vmem>>, vector<1x64xf32>
    %c0_1 = arith.constant 0 : index
    %c0_2 = arith.constant 0 : index
    %1 = vector.load %arg2[%c0_1, %c0_2] : memref<64x64xf32, #tpu.memory_space<vmem>>, vector<64x64xf32>
    %cst = arith.constant dense<0.000000e+00> : vector<1x64xf32>
    %2 = tpu.matmul %0, %1, %cst {dimension_numbers = #tpu.dot_dimension_numbers<[1], [0], [0], [1], [0, 0, 1, 1], [], []>} : vector<1x64xf32>, vector<64x64xf32>, vector<1x64xf32> -> vector<1x64xf32>
    %c0_3 = arith.constant 0 : index
    %c0_4 = arith.constant 0 : index
    %3 = vector.load %arg0[%c0_3, %c0_4] : memref<1x64xf32, #tpu.memory_space<vmem>>, vector<1x64xf32>
    %4 = arith.addf %2, %3 : vector<1x64xf32>
    %c0_5 = arith.constant 0 : index
    %c0_6 = arith.constant 0 : index
    %5 = vector.load %arg3[%c0_5, %c0_6] : memref<1x64xf32, #tpu.memory_space<vmem>>, vector<1x64xf32>
    tpu.vector_store %arg3[%c0_5, %c0_6], %4 {strides = array<i32>} : memref<1x64xf32, #tpu.memory_space<vmem>>, vector<1x64xf32>,
    return
  }
}

</mosaic_0001>

<bundles_post_ra>
// kernel: forward.1
= control target key start
LH: loop header
LB: loop body
LE: loop exit
PB: predicated region body
PF: predicated region fallthrough
CT: control target
= control target key end

     0   :  { %8 = vsyncpa [#allocation3], 0  ;;  %s284_s0 = inlined_call_operand.vmem [shape: f32[1,64], index: 0, kind: input, shape index: {}]   ;;  %s285_s1 = inlined_call_operand.hbm [shape: f32[1,64], index: 1, kind: input, shape index: {}]   ;;  %s286_s2 = inlined_call_operand.hbm [shape: f32[64,64], index: 2, kind: input, shape index: {}]   ;;  %s287_s3 = inlined_call_operand.hbm [shape: f32[1,64], index: 3, kind: output, shape index: {}]  }
   0x1   :  { %9 = vsyncpa [#allocation6], 0 }
   0x2   :  { %10 = vsyncpa [#allocation4], 0  ;;  %s245_s12 = smov [#allocation2]   ;;  %s246_s14 = smov [#allocation5]  }
   0x3   :  { %s19_s13 = sshll.u32 %s245_s12, 4  ;;  %s28_s15 = sshll.u32 %s246_s14, 4  ;;  %s20_s13 = int_to_ptr.vmem [resolvable:$true] %s19_s13  ;;  %s29_s15 = int_to_ptr.vmem [resolvable:$true] %s28_s15 }
   0x4   :  { %s187_s16 = scalar_lea.vmem %s20_s13, 16  ;;  %s191_s17 = scalar_lea.vmem %s20_s13, 32 }
   0x5   :  { %p188_p0 = scmp.ne.s32.totalorder %s20_s13, %s187_s16  ;;  %p192_p1 = scmp.lt.s32.totalorder %s20_s13, %s20_s13 }
   0x6   :  { %p193_p2 = scmp.lt.s32.totalorder %s191_s17, %s187_s16 }
   0x8   :  { %p194_p3 = por %p193_p2, %p192_p1 }
   0xa   :  { %p195_p4 = pnand %p194_p3, %p188_p0 }
   0xc   :  { %198 = shalt.err (!%p195_p4)
}
   0xd   :  { %22 = dma.hbm_to_vmem [thread:$0]  %s285_s1, 16, %s20_s13, [#allocation3]  }
   0xe   :  { %s207_s20 = scalar_lea.vmem %s29_s15, 1024  ;;  %p212_p6 = scmp.lt.s32.totalorder %s29_s15, %s29_s15 }
   0xf   :  { %p208_p5 = scmp.ne.s32.totalorder %s29_s15, %s207_s20  ;;  %p213_p7 = scmp.lt.s32.totalorder %s207_s20, %s207_s20 }
  0x11   :  { %p214_p8 = por %p213_p7, %p212_p6 }
  0x13   :  { %p215_p9 = pnand %p214_p8, %p208_p5 }
  0x15   :  { %218 = shalt.err (!%p215_p9)
}
  0x16   :  { %s247_s21 = smov 128   ;;  %s248_s22 = smov 8  }
  0x17   :  { %34 = dma.hbm_to_vmem [thread:$0]  %s286_s2, 1024, %s29_s15, [#allocation6], %s247_s21, %s247_s21, %s248_s22  }
  0x18   :  { %239 = dma.done.wait [#allocation3], 16  }
  0x19   :  { %240 = vsyncadd [#allocation3], 4294967280 }
  0x1a   :  { %241 = dma.done.wait [#allocation6], 1024  }
  0x1b   :  { %242 = vsyncadd [#allocation6], 4294966272  ;;  %v249_v0 = vmov 0.0   ;;  %vm250_vm0 = vmmov 0   ;;  %v49_v1 = vld [vmem:[#allocation5 + $0x38] sm:$0xff]  ;;  %v48_v2 = vld [vmem:[#allocation5 + $0x30] sm:$0xff] }
  0x1c   :  { %153 = vmatprep.subr.mxu0 %v249_v0  ;;  %169 = vmatprep.mubr.msk.f32.mxu0 %vm250_vm0, %v249_v0  ;;  %v47_v3 = vld [vmem:[#allocation5 + $0x28] sm:$0xff]  ;;  %v46_v4 = vld [vmem:[#allocation5 + $0x20] sm:$0xff]  ;;  %v45_v5 = vld [vmem:[#allocation5 + $0x18] sm:$0xff]  ;;  %vm51_vm1 = vcmask 523264   ;;  %s251_s25 = smov [#allocation7]   ;;  %vm125_vm2 = vcmask 516096  }
  0x1d   :  { %154 = vmatpush3.msra.mxu0 %v49_v1  ;;  %v44_v6 = vld [vmem:[#allocation5 + $0x10] sm:$0xff]  ;;  %v43_v7 = vld [vmem:[#allocation5 + $0x8] sm:$0xff]  ;;  %v42_v8 = vld [vmem:[#allocation5] sm:$0xff]  ;;  %s133_s26 = sshll.u32 %s251_s25, 4  ;;  %s134_s26 = int_to_ptr.vmem [resolvable:$true] %s133_s26 }
  0x1e   :  { %155 = vmatprep.subr.mxu0 %v249_v0  ;;  %v41_v9 = vld [vmem:[#allocation2] sm:$0x1]  ;;  %s219_s27 = scalar_lea.vmem %s134_s26, 16  ;;  %s223_s28 = scalar_lea.vmem %s134_s26, 32 }
  0x1f   :  { %156 = vmatpush3.msra.mxu0 %v48_v2  ;;  %v50_v10 = vld [vmem:[%s284_s0] sm:$0x1]  ;;  %p220_p10 = scmp.ne.s32.totalorder %s134_s26, %s219_s27  ;;  %p224_p11 = scmp.lt.s32.totalorder %s134_s26, %s134_s26 }
  0x20   :  { %157 = vmatprep.subr.mxu0 %v249_v0  ;;  %p225_p12 = scmp.lt.s32.totalorder %s223_s28, %s219_s27 }
  0x21   :  { %158 = vmatpush3.msra.mxu0 %v47_v3 }
  0x22   :  { %159 = vmatprep.subr.mxu0 %v249_v0  ;;  %p226_p13 = por %p225_p12, %p224_p11 }
  0x23   :  { %160 = vmatpush3.msra.mxu0 %v46_v4 }
  0x24   :  { %161 = vmatprep.subr.mxu0 %v249_v0  ;;  %p227_p0 = pnand %p226_p13, %p220_p10 }
  0x25   :  { %162 = vmatpush3.msra.mxu0 %v45_v5 }
  0x26   :  { %163 = vmatprep.subr.mxu0 %v249_v0 }
  0x27   :  { %164 = vmatpush3.msra.mxu0 %v44_v6 }
  0x28   :  { %165 = vmatprep.subr.mxu0 %v249_v0 }
  0x29   :  { %166 = vmatpush3.msra.mxu0 %v43_v7 }
  0x2a   :  { %167 = vmatprep.subr.mxu0 %v249_v0 }
  0x2b   :  { %168 = vmatpush3.msra.mxu0 %v42_v8 }
  0x2c   :  { %170 = vmatmul.mubr.msk.f32.vlgmr.msra.gmra.mxu0 %vm51_vm1, %v41_v9 }
  0xec   :  { %v121_v11 = vpop.f32.mrf.mxu0 }
  0xed   :  { %v122_v12 = vadd.f32 %v121_v11, %v50_v10 }
  0xee   :  { %v171_v13 = vpop.f32.mrf.mxu0 }
  0xef   :  { %126 = vst.msk [vmem:[#allocation7] sm:$0x1] %vm125_vm2, %v122_v12 }
  0xf0   :  { %230 = shalt.err (!%p227_p0)
}
  0xf1   :  { %136 = dma.vmem_to_hbm [thread:$0]  %s134_s26, 16, %s287_s3, [#allocation4]  }
  0xf2   :  { %243 = dma.done.wait [#allocation4], 16  }
  0xf3   :  { %244 = vsyncadd [#allocation4], 4294967280 }
  0xf4   :  { %140 = vsyncpa [#allocation3], 1 }
  0xf5   :  { %141 = vsyncpa [#allocation6], 1 }
  0xf6   :  { %142 = vsyncpa [#allocation4], 1 }

</bundles_post_ra>
